<compile_context>
chip_gen: v5e
topology: v5e:2x2
jax: 0.10.0
libtpu: 0.0.40
codegen_flags: <defaults>
</compile_context>

<pallas_src>
import jax
import jax.numpy as jnp
from jax.experimental import pallas as pl
from jax.experimental.pallas import tpu as pltpu  # noqa: F401  (kept for parity / future tuning)

# Problem sizes (small, consistent with the module: c classes, batch of inputs).
B = 16        # total batch (single block — no grid)
D_IN = 32     # input feature dim
H = 32        # classifier hidden / embedding dim
C = 8         # number of classes  (the "c" in BCE_DUQLoss.__init__)
SIGMA2 = 0.5  # RBF length-scale^2 for the DUQ head

INV_SCALE = -1.0 / (2.0 * SIGMA2 * H)   # logits = d2 * INV_SCALE  (negative)
INV_BC = 1.0 / float(B * C)             # mean-reduction factor


def _bce_duq_kernel(x_ref, rhs_ref, b_ref, t_ref, o_ref):
    x = x_ref[...]            # (B, D_IN)      f32
    rhs = rhs_ref[...]        # (D_IN, H + C)  f32   [ W | A ], A = -2*INV_SCALE * (W@E)
    b = b_ref[...]            # (1, C)         f32   INV_SCALE * sum(E*E, axis=0)
    t = t_ref[...]            # (B, 1)         int32

    # --- classifier: one independent MXU pass yields both f and the cross term ---
    fw = jnp.dot(x, rhs, preferred_element_type=jnp.float32)   # (B, H + C)
    f = fw[:, :H]                                              # (B, H)
    xa = fw[:, H:]                                             # (B, C) == -2*INV_SCALE * (f @ E)

    f2 = jnp.sum(f * f, axis=-1, keepdims=True)                # (B, 1)
    # logits = INV_SCALE * max(||f - e_c||^2, 0); since INV_SCALE < 0 the clamp
    # becomes a min-at-0 (kills the cancellation -> y_pred > 1 -> NaN hazard).
    logits = jnp.minimum(INV_SCALE * f2 + xa + b, 0.0)         # (B, C), <= 0

    # --- Y_pred = exp(classifier(inputs)); BCE against one-hot(targets) ---------
    y_pred = jnp.exp(logits)                                   # in (0, 1]
    log_p = jnp.maximum(logits, -100.0)                        # log(y_pred) == logits exactly
    log_1mp = jnp.maximum(jnp.log(1.0 - y_pred), -100.0)       # -inf -> -100 at y_pred == 1

    cls_ids = jax.lax.broadcasted_iota(jnp.int32, logits.shape, 1)
    bce = -jnp.where(cls_ids == t, log_p, log_1mp)             # (B, C)

    # Single full reduce with the mean factor folded in.
    o_ref[...] = jnp.sum(bce, keepdims=True) * INV_BC          # (1, 1)


def bce_duq_loss(inputs, w, e, targets):
    """inputs: (B, D_IN) f32, w: (D_IN, H) f32, e: (H, C) f32, targets: (B,) int32."""
    # Parameter-only precompute (hoisted out of the kernel, constants folded in).
    a = (-2.0 * INV_SCALE) * (w @ e)                           # (D_IN, C)
    rhs = jnp.concatenate([w, a], axis=1)                      # (D_IN, H + C)
    b = INV_SCALE * jnp.sum(e * e, axis=0, keepdims=True)      # (1, C)
    t2d = targets.reshape(B, 1).astype(jnp.int32)

    # Whole problem fits one VMEM block -> no grid, no pipelining, no per-step overhead.
    out = pl.pallas_call(
        _bce_duq_kernel,
        out_shape=jax.ShapeDtypeStruct((1, 1), jnp.float32),
    )(inputs, rhs, b, t2d)
    return out[0, 0]


def _reference(inputs, w, e, targets):
    # Pure-JAX reference of the same forward (faithful to the PyTorch module).
    f = inputs @ w
    fe = f @ e
    e2 = jnp.sum(e * e, axis=0, keepdims=True)
    d2 = jnp.maximum(jnp.sum(f * f, -1, keepdims=True) + e2 - 2.0 * fe, 0.0)
    logits = d2 * INV_SCALE
    p = jnp.exp(logits)
    y = jax.nn.one_hot(targets, C, dtype=jnp.float32)
    log_p = jnp.maximum(logits, -100.0)
    log_1mp = jnp.maximum(jnp.log(1.0 - p), -100.0)
    return jnp.mean(-(y * log_p + (1.0 - y) * log_1mp))


if __name__ == "__main__":
    key = jax.random.PRNGKey(0)
    k_x, k_w, k_e, k_t = jax.random.split(key, 4)

    # Deterministic synthetic parameters (classifier weights + class centroids).
    x = jax.random.normal(k_x, (B, D_IN), dtype=jnp.float32)
    w = jax.random.normal(k_w, (D_IN, H), dtype=jnp.float32) * (1.0 / jnp.sqrt(D_IN))
    e = jax.random.normal(k_e, (H, C), dtype=jnp.float32)
    targets = jax.random.randint(k_t, (B,), 0, C, dtype=jnp.int32)

    loss = bce_duq_loss(x, w, e, targets)
    jax.block_until_ready(loss)

    ref = _reference(x, w, e, targets)
    assert jnp.allclose(loss, ref, rtol=1e-5, atol=1e-5), (loss, ref)

    print("KERNEL_OK")
</pallas_src>

<mosaic_0001>
module attributes {stable_mosaic.version = 11 : i64} {
  func.func @_bce_duq_kernel(%arg0: memref<16x32xf32, #tpu.memory_space<vmem>>, %arg1: memref<32x40xf32, #tpu.memory_space<vmem>>, %arg2: memref<1x8xf32, #tpu.memory_space<vmem>>, %arg3: memref<16x1xi32, #tpu.memory_space<vmem>>, %arg4: memref<1x1xf32, #tpu.memory_space<vmem>>) attributes {dimension_semantics = [], scalar_prefetch = 0 : i64, scratch_operands = 0 : i64, tpu.core_type = #tpu.core_type<tc>} {
    %c0 = arith.constant 0 : index
    %c0_0 = arith.constant 0 : index
    %0 = vector.load %arg0[%c0, %c0_0] : memref<16x32xf32, #tpu.memory_space<vmem>>, vector<16x32xf32>
    %c0_1 = arith.constant 0 : index
    %c0_2 = arith.constant 0 : index
    %1 = vector.load %arg1[%c0_1, %c0_2] : memref<32x40xf32, #tpu.memory_space<vmem>>, vector<32x40xf32>
    %c0_3 = arith.constant 0 : index
    %c0_4 = arith.constant 0 : index
    %2 = vector.load %arg2[%c0_3, %c0_4] : memref<1x8xf32, #tpu.memory_space<vmem>>, vector<1x8xf32>
    %c0_5 = arith.constant 0 : index
    %c0_6 = arith.constant 0 : index
    %3 = vector.load %arg3[%c0_5, %c0_6] : memref<16x1xi32, #tpu.memory_space<vmem>>, vector<16x1xi32>
    %cst = arith.constant dense<0.000000e+00> : vector<16x40xf32>
    %4 = tpu.matmul %0, %1, %cst {dimension_numbers = #tpu.dot_dimension_numbers<[1], [0], [0], [1], [0, 0, 1, 1], [], []>} : vector<16x32xf32>, vector<32x40xf32>, vector<16x40xf32> -> vector<16x40xf32>
    %5 = vector.extract_strided_slice %4 {offsets = [0, 0], sizes = [16, 32], strides = [1, 1]} : vector<16x40xf32> to vector<16x32xf32>
    %6 = vector.extract_strided_slice %4 {offsets = [0, 32], sizes = [16, 8], strides = [1, 1]} : vector<16x40xf32> to vector<16x8xf32>
    %7 = arith.mulf %5, %5 : vector<16x32xf32>
    %cst_7 = arith.constant dense<0.000000e+00> : vector<16xf32>
    %8 = vector.multi_reduction <add>, %7, %cst_7 [1] : vector<16x32xf32> to vector<16xf32>
    %9 = vector.shape_cast %8 : vector<16xf32> to vector<16x1xf32>
    %cst_8 = arith.constant -3.125000e-02 : f32
    %10 = vector.broadcast %cst_8 : f32 to vector<16x1xf32>
    %11 = arith.mulf %10, %9 : vector<16x1xf32>
    %12 = vector.broadcast %11 : vector<16x1xf32> to vector<16x8xf32>
    %13 = arith.addf %12, %6 : vector<16x8xf32>
    %14 = vector.broadcast %2 : vector<1x8xf32> to vector<16x8xf32>
    %15 = arith.addf %13, %14 : vector<16x8xf32>
    %cst_9 = arith.constant 0.000000e+00 : f32
    %16 = vector.broadcast %cst_9 : f32 to vector<16x8xf32>
    %17 = arith.minimumf %15, %16 : vector<16x8xf32>
    %18 = math.exp %17 : vector<16x8xf32>
    %cst_10 = arith.constant -1.000000e+02 : f32
    %19 = vector.broadcast %cst_10 : f32 to vector<16x8xf32>
    %20 = arith.maximumf %17, %19 : vector<16x8xf32>
    %cst_11 = arith.constant 1.000000e+00 : f32
    %21 = vector.broadcast %cst_11 : f32 to vector<16x8xf32>
    %22 = arith.subf %21, %18 : vector<16x8xf32>
    %23 = math.log %22 : vector<16x8xf32>
    %cst_12 = arith.constant -1.000000e+02 : f32
    %24 = vector.broadcast %cst_12 : f32 to vector<16x8xf32>
    %25 = arith.maximumf %23, %24 : vector<16x8xf32>
    %26 = tpu.iota {dimensions = array<i32: 1>} : vector<16x8xi32>
    %27 = vector.broadcast %3 : vector<16x1xi32> to vector<16x8xi32>
    %28 = arith.cmpi eq, %26, %27 : vector<16x8xi32>
    %29 = arith.select %28, %20, %25 : vector<16x8xi1>, vector<16x8xf32>
    %cst_13 = arith.constant 0.000000e+00 : f32
    %30 = vector.broadcast %cst_13 : f32 to vector<16x8xf32>
    %31 = arith.subf %30, %29 : vector<16x8xf32>
    %32 = vector.shape_cast %31 : vector<16x8xf32> to vector<1x16x8xf32>
    %cst_14 = arith.constant dense<0.000000e+00> : vector<1xf32>
    %33 = vector.multi_reduction <add>, %32, %cst_14 [1, 2] : vector<1x16x8xf32> to vector<1xf32>
    %34 = vector.shape_cast %33 : vector<1xf32> to vector<1x1x1xf32>
    %35 = vector.extract %34[0, 0, 0] : f32 from vector<1x1x1xf32>
    %36 = vector.broadcast %35 : f32 to vector<1x1xf32>
    %cst_15 = arith.constant 7.812500e-03 : f32
    %37 = vector.broadcast %cst_15 : f32 to vector<1x1xf32>
    %38 = arith.mulf %36, %37 : vector<1x1xf32>
    %c0_16 = arith.constant 0 : index
    %c0_17 = arith.constant 0 : index
    %39 = vector.load %arg4[%c0_16, %c0_17] : memref<1x1xf32, #tpu.memory_space<vmem>>, vector<1x1xf32>
    tpu.vector_store %arg4[%c0_16, %c0_17], %38 {strides = array<i32>} : memref<1x1xf32, #tpu.memory_space<vmem>>, vector<1x1xf32>,
    return
  }
}

</mosaic_0001>

<bundles_post_ra>
// kernel: tpu_custom_call.1
= control target key start
LH: loop header
LB: loop body
LE: loop exit
PB: predicated region body
PF: predicated region fallthrough
CT: control target
= control target key end

     0   :  { %9 = vsyncpa [#allocation3], 0  ;;  %s308_s0 = inlined_call_operand.vmem [shape: f32[16,32], index: 0, kind: input, shape index: {}]   ;;  %s309_s1 = inlined_call_operand.hbm [shape: f32[32,40], index: 1, kind: input, shape index: {}]   ;;  %s310_s2 = inlined_call_operand.vmem [shape: f32[1,8], index: 2, kind: input, shape index: {}]   ;;  %s311_s3 = inlined_call_operand.vmem [shape: s32[16,1], index: 3, kind: input, shape index: {}]   ;;  %s312_s4 = inlined_call_operand.hbm [shape: f32[1,1], index: 4, kind: output, shape index: {}]  }
   0x1   :  { %10 = vsyncpa [#allocation4], 0  ;;  %s17_s17 = sshll.u32 %s309_s1, 4  ;;  %s251_s18 = smov [#allocation2]   ;;  %s18_s17 = int_to_ptr.hbm [resolvable:$true] %s17_s17 }
   0x2   :  { %s19_s19 = sshll.u32 %s251_s18, 4  ;;  %s252_s20 = smov 128   ;;  %s20_s19 = int_to_ptr.vmem [resolvable:$true] %s19_s19 }
   0x3   :  { %s253_s21 = smov 8  }
   0x4   :  { %25 = dma.hbm_to_vmem [thread:$0]  %s18_s17, 512, %s20_s19, [#allocation3], %s252_s20, %s252_s20, %s253_s21  }
   0x5   :  { %247 = dma.done.wait [#allocation3], 512  }
   0x6   :  { %248 = vsyncadd [#allocation3], 4294966784  ;;  %v39_v0 = vld [vmem:[#allocation2 + $0x18] sm:$0xff]  ;;  %v38_v1 = vld [vmem:[#allocation2 + $0x10] sm:$0xff]  ;;  %vm43_vm0 = vcmask 261120   ;;  %s254_s27 = smov 32   ;;  %v108_v42 = vlaneseq }
   0x7   :  { %62 = vmatpush.msra.mxu0 %v39_v0  ;;  %174 = vmatpush.msra.mxu1 %v39_v0  ;;  %v37_v2 = vld [vmem:[#allocation2 + $0x8] sm:$0xff]  ;;  %v36_v3 = vld [vmem:[#allocation2] sm:$0xff]  ;;  %v255_v13 = vmov 0   ;;  %s256_s30 = smov 96   ;;  %vm138_vm3 = vcmask 64512   ;;  %s162_s8 = sshll.u32 %s312_s4, 4  ;;  %s163_s8 = int_to_ptr.hbm [resolvable:$true] %s162_s8 }
   0x8   :  { %v34_v4 = vld [vmem:[%s308_s0] sm:$0xff]  ;;  %v35_v5 = vld [vmem:[%s308_s0 + $0x8] sm:$0xff]  ;;  %188 = vset.pattern.permute.xlu2 %v255_v13  ;;  %187 = vset.pattern.permute.xlu1 %v255_v13  ;;  %v109_v45 = vand.u32 127, %v108_v42  ;;  %vm153_vm4 = vcmask 0  }
   0x9   :  { %63 = vmatpush.msra.mxu0 %v38_v1  ;;  %175 = vmatpush.msra.mxu1 %v38_v1  ;;  %v190_v6 = vld [vmem:[%s310_s2] ss:$0 sm:$0xff]  ;;  %v42_v14 = vld [vmem:[%s311_s3 + $0x8] sm:$0xff] }
   0xa   :  { %87 = vrot.lane.b32.xlu1 %v190_v6, %s254_s27  ;;  %114 = vperm.xlu2 %188, %v42_v14   ;;  %v41_v15 = vld [vmem:[%s311_s3] sm:$0xff]  ;;  %s257_s3 = smov [#allocation5]  }
   0xb   :  { %64 = vmatpush.msra.mxu0 %v37_v2  ;;  %176 = vmatpush.msra.mxu1 %v37_v2  ;;  %s160_s5 = sshll.u32 %s257_s3, 4  ;;  %s161_s5 = int_to_ptr.vmem [resolvable:$true] %s160_s5 }
   0xc   :  { %189 = vset.pattern.permute.xlu0 %v255_v13 }
   0xd   :  { %65 = vmatpush.msra.mxu0 %v36_v3  ;;  %177 = vmatpush.msra.mxu1 %v36_v3 }
   0xe   :  { %172 = vmatmul.msk.f32.vlgmr.msra.gmra.mxu0 %vm43_vm0, %v34_v4  ;;  %173 = vmatmul.msk.f32.vlgmr.msra.gmra.mxu1 %vm43_vm0, %v35_v5 }
  0x12   :  { %111 = vperm.xlu1 %187, %v41_v15  }
  0x64   :  { %v115_v41 = vpop.permute.xlu2 %114 }
  0x65   :  { %vm117_vm1 = vcmp.eq.s32.totalorder %v109_v45, %v115_v41 }
  0x7c   :  { %v88_v18 = vpop.permute.xlu1 %87 }
  0x84   :  { %v112_v44 = vpop.permute.xlu1 %111 }
  0x85   :  { %vm116_vm2 = vcmp.eq.s32.totalorder %v109_v45, %v112_v44 }
  0x8b   :  { %v67_v7 = vpop.f32.mrf.mxu0  ;;  %v70_v9 = vpop.f32.mrf.mxu1 }
  0x8c   :  { %v73_v8 = vmul.f32 %v67_v7, %v67_v7  ;;  %v74_v11 = vmul.f32 %v70_v9, %v70_v9 }
  0x8e   :  { %v75_v10 = vsel %vm43_vm0, %v73_v8, 0.0  ;;  %v78_v12 = vsel %vm43_vm0, %v74_v11, 0.0 }
  0x8f   :  { %76 = vadd.xlane.f32.xlu0 %v75_v10 }
  0x97   :  { %79 = vadd.xlane.f32.xlu0 %v78_v12 }
 0x102   :  { %v77_v16 = vpop.xlane.xlu0 %76 }
 0x103   :  { %v81_v17 = vmul.f32 -0.03125, %v77_v16 }
 0x105   :  { %v83_v19 = vadd.f32 %v81_v17, %v67_v7 }
 0x107   :  { %v90_v20 = vadd.f32 %v88_v18, %v83_v19 }
 0x109   :  { %v92_v21 = vmin.f32 %v90_v20, 0.0 }
 0x10a   :  { %v80_v22 = vpop.xlane.xlu0 %79 }
 0x10b   :  { %v94_v23 = vmul.f32 1.442695, %v92_v21  ;;  %v82_v24 = vmul.f32 -0.03125, %v80_v22  ;;  %v98_v25 = vmax.f32 %v92_v21, -100.0 }
 0x10d   :  { %191 = vpow2.f32 %v94_v23  ;;  %v84_v26 = vadd.f32 %v82_v24, %v70_v9  ;;  %120 = vrot.lane.b32.xlu2 %v98_v25, %s256_s30 }
 0x10f   :  { %v91_v27 = vadd.f32 %v88_v18, %v84_v26 }
 0x111   :  { %v93_v28 = vmin.f32 %v91_v27, 0.0 }
 0x113   :  { %v192_v29 = vpop.eup %191  ;;  %v96_v30 = vmul.f32 1.442695, %v93_v28  ;;  %v99_v31 = vmax.f32 %v93_v28, -100.0 }
 0x114   :  { %v100_v32 = vsub.f32 1.0, %v192_v29 }
 0x115   :  { %193 = vpow2.f32 %v96_v30  ;;  %122 = vrot.lane.b32.xlu0 %v99_v31, %s256_s30 }
 0x116   :  { %195 = vlog2.f32 %v100_v32 }
 0x11b   :  { %v194_v33 = vpop.eup %193 }
 0x11c   :  { %v196_v34 = vpop.eup %195  ;;  %v101_v35 = vsub.f32 1.0, %v194_v33 }
 0x11d   :  { %v103_v36 = vmul.f32 0.6931472, %v196_v34 }
 0x11e   :  { %197 = vlog2.f32 %v101_v35 }
 0x11f   :  { %v106_v37 = vmax.f32 %v103_v36, -100.0 }
 0x121   :  { %128 = vrot.lane.b32.xlu1 %v106_v37, %s256_s30 }
 0x124   :  { %v198_v38 = vpop.eup %197 }
 0x125   :  { %v105_v39 = vmul.f32 0.6931472, %v198_v38 }
 0x127   :  { %v107_v40 = vmax.f32 %v105_v39, -100.0 }
 0x129   :  { %130 = vrot.lane.b32.xlu2 %v107_v40, %s256_s30 }
 0x167   :  { %v121_v43 = vpop.permute.xlu2 %120 }
 0x183   :  { %v131_v47 = vpop.permute.xlu2 %130 }
 0x187   :  { %v123_v46 = vpop.permute.xlu0 %122 }
 0x188   :  { %v135_v48 = vsel %vm117_vm1, %v123_v46, %v131_v47 }
 0x189   :  { %v137_v49 = vsub.f32 0.0, %v135_v48 }
 0x18b   :  { %v140_v54 = vsel %vm138_vm3, %v137_v49, 0.0 }
 0x193   :  { %v129_v50 = vpop.permute.xlu1 %128 }
 0x194   :  { %v134_v51 = vsel %vm116_vm2, %v121_v43, %v129_v50 }
 0x195   :  { %v136_v52 = vsub.f32 0.0, %v134_v51 }
 0x197   :  { %v139_v53 = vsel %vm138_vm3, %v136_v52, 0.0 }
 0x198   :  { %v141_v55 = vadd.f32 %v140_v54, %v139_v53 }
 0x19a   :  { %142 = vadd.xlane.f32.xlu1 %v141_v55 }
 0x20d   :  { %v143_v56 = vpop.xlane.xlu1 %142 }
 0x20e   :  { %v144_v57 = vrot.slane %v143_v56, 4 }
 0x210   :  { %v145_v58 = vadd.f32 %v144_v57, %v143_v56 }
 0x212   :  { %v146_v59 = vrot.slane %v145_v58, 2 }
 0x214   :  { %v147_v60 = vadd.f32 %v146_v59, %v145_v58 }
 0x216   :  { %v148_v61 = vrot.slane %v147_v60, 1 }
 0x218   :  { %v149_v62 = vadd.f32 %v148_v61, %v147_v60 }
 0x21a   :  { %178 = vpush %v149_v62 }
 0x24b   :  { %s179_s9 = spop %178 }
 0x24c   :  { %v151_v63 = vstv %s179_s9 }
 0x24d   :  { %v152_v0 = vmul.f32 0.0078125, %v151_v63 }
 0x24f   :  { %154 = vst.msk [vmem:[#allocation5] sm:$0x1] %vm153_vm4, %v152_v0 }
 0x250   :  { %165 = dma.vmem_to_hbm [thread:$0]  %s161_s5, 16, %s163_s8, [#allocation4]  }
 0x251   :  { %249 = dma.done.wait [#allocation4], 16  }
 0x252   :  { %250 = vsyncadd [#allocation4], 4294967280 }
 0x253   :  { %170 = vsyncpa [#allocation3], 1 }
 0x254   :  { %171 = vsyncpa [#allocation4], 1 }

</bundles_post_ra>
